<compile_context>
chip_gen: v7x
topology: tpu7x:2x2x1
jax: 0.10.0
libtpu: 0.0.40
codegen_flags: <defaults>
</compile_context>

<pallas_src>
import jax
import jax.numpy as jnp
from jax.experimental import pallas as pl
from jax.experimental.pallas import tpu as pltpu


def _round_up(a, b):
    return ((a + b - 1) // b) * b


def _esm_linear_kernel(x_ref, w_ref, b_ref, o_ref, acc_ref):
    # x_ref: (tm, tk)   w_ref: (tk, tn)   b_ref: (1, tn)   o_ref: (tm, tn)
    # acc_ref: (tm, tn) f32 scratch, resident across the K grid axis (last axis).
    k = pl.program_id(3)

    @pl.when(k == 0)
    def _():
        acc_ref[...] = jnp.zeros_like(acc_ref)

    acc_ref[...] += jnp.dot(
        x_ref[...], w_ref[...], preferred_element_type=jnp.float32
    )

    @pl.when(k == pl.num_programs(3) - 1)
    def _():
        o_ref[...] = (
            acc_ref[...] + b_ref[...].astype(jnp.float32)
        ).astype(o_ref.dtype)


def esm_linear(
    x,
    weights,
    biases,
    *,
    tm=256,
    tn=512,
    tk=512,
    compute_dtype=None,
    vmem_limit_bytes=48 * 1024 * 1024,
):
    """Ensemble linear forward (EsmLinear, mem_idx is None path).

    x:       (B, K) with B = num_member * N  (member-major batch ordering)
    weights: (num_member, K, O)   (torch Linear weight transposed per member)
    biases:  (num_member, O)
    returns: (B, O) in x's dtype
    """
    num_member, K, O = weights.shape
    B = x.shape[0]
    assert B % num_member == 0, "batch must be divisible by num_member"
    N = B // num_member
    out_dtype = x.dtype

    # Optional low-precision streaming (accumulation stays f32 on the MXU).
    if compute_dtype is not None:
        x = x.astype(compute_dtype)
        weights = weights.astype(compute_dtype)

    # --- tile sizes: MXU/lane aligned, clamped to (padded) problem dims ---
    tm = min(tm, _round_up(N, 8))      # sublane multiple
    tn = min(tn, _round_up(O, 128))    # lane multiple -> lane-dense stores
    tk = min(tk, _round_up(K, 128))
    assert tm % 8 == 0 and tn % 128 == 0 and tk % 128 == 0

    N_pad = _round_up(N, tm)
    O_pad = _round_up(O, tn)
    K_pad = _round_up(K, tk)

    # --- member-major view + zero padding (zeros in K contribute nothing) ---
    x3 = x.reshape(num_member, N, K)
    if (N_pad, K_pad) != (N, K):
        x3 = jnp.pad(x3, ((0, 0), (0, N_pad - N), (0, K_pad - K)))
    w3 = weights
    if (K_pad, O_pad) != (K, O):
        w3 = jnp.pad(w3, ((0, 0), (0, K_pad - K), (0, O_pad - O)))
    b3 = biases.reshape(num_member, 1, O)
    if O_pad != O:
        b3 = jnp.pad(b3, ((0, 0), (0, 0), (0, O_pad - O)))

    grid = (num_member, N_pad // tm, O_pad // tn, K_pad // tk)

    cost = pl.CostEstimate(
        flops=2 * num_member * N_pad * K_pad * O_pad,
        transcendentals=0,
        bytes_accessed=(
            x3.size * x3.dtype.itemsize
            + w3.size * w3.dtype.itemsize
            + b3.size * b3.dtype.itemsize
            + num_member * N_pad * O_pad * jnp.dtype(out_dtype).itemsize
        ),
    )

    out3 = pl.pallas_call(
        _esm_linear_kernel,
        out_shape=jax.ShapeDtypeStruct((num_member, N_pad, O_pad), out_dtype),
        grid_spec=pltpu.PrefetchScalarGridSpec(
            num_scalar_prefetch=0,
            grid=grid,
            in_specs=[
                # member dim squeezed (None) -> kernel sees 2-D tiles.
                pl.BlockSpec((None, tm, tk), lambda m, i, j, k: (m, i, k)),
                pl.BlockSpec((None, tk, tn), lambda m, i, j, k: (m, k, j)),
                pl.BlockSpec((None, 1, tn), lambda m, i, j, k: (m, 0, j)),
            ],
            out_specs=pl.BlockSpec((None, tm, tn), lambda m, i, j, k: (m, i, j)),
            scratch_shapes=[pltpu.VMEM((tm, tn), jnp.float32)],
        ),
        compiler_params=pltpu.CompilerParams(
            dimension_semantics=("parallel", "parallel", "parallel", "arbitrary"),
            vmem_limit_bytes=vmem_limit_bytes,
        ),
        cost_estimate=cost,
    )(x3, w3, b3)

    return out3[:, :N, :O].reshape(B, O)


def _reference(x, weights, biases, num_member):
    B = x.shape[0]
    N = B // num_member
    return jnp.concatenate(
        [x[i * N:(i + 1) * N] @ weights[i] + biases[i] for i in range(num_member)],
        axis=0,
    )


if __name__ == "__main__":
    key = jax.random.PRNGKey(0)

    # --- Case 1: small shapes consistent with the module (B=8, K=32, O=64) ---
    num_member = 2
    in_features = 32
    out_features = 64
    N = 4
    B = num_member * N

    kx, kw, kb, key = jax.random.split(key, 4)
    x = jax.random.normal(kx, (B, in_features), dtype=jnp.float32)
    weights = jax.random.normal(
        kw, (num_member, in_features, out_features), dtype=jnp.float32
    ) * 0.05
    biases = jax.random.normal(kb, (num_member, out_features), dtype=jnp.float32) * 0.05

    out = jax.block_until_ready(esm_linear(x, weights, biases))
    ref = _reference(x, weights, biases, num_member)
    assert out.shape == (B, out_features)
    assert jnp.allclose(out, ref, atol=1e-5, rtol=1e-5)

    # --- Case 2: unaligned dims + multi-tile grid (exercises padding & K reduction) ---
    num_member2, N2, K2, O2 = 3, 20, 300, 200
    B2 = num_member2 * N2
    kx, kw, kb, key = jax.random.split(key, 4)
    x2 = jax.random.normal(kx, (B2, K2), dtype=jnp.float32)
    w2 = jax.random.normal(kw, (num_member2, K2, O2), dtype=jnp.float32) * 0.05
    b2 = jax.random.normal(kb, (num_member2, O2), dtype=jnp.float32) * 0.05

    out2 = jax.block_until_ready(
        esm_linear(x2, w2, b2, tm=8, tn=128, tk=128)  # grid = (3, 3, 2, 3)
    )
    ref2 = _reference(x2, w2, b2, num_member2)
    assert out2.shape == (B2, O2)
    assert jnp.allclose(out2, ref2, atol=1e-4, rtol=1e-4)

    print("KERNEL_OK")
</pallas_src>

<mosaic_0001>
module attributes {stable_mosaic.version = 11 : i64} {
  func.func @_esm_linear_kernel(%arg0: i32, %arg1: i32, %arg2: i32, %arg3: i32, %arg4: memref<1x8x128xf32, #tpu.memory_space<vmem>>, %arg5: memref<1x128x128xf32, #tpu.memory_space<vmem>>, %arg6: memref<1x1x128xf32, #tpu.memory_space<vmem>>, %arg7: memref<1x8x128xf32, #tpu.memory_space<vmem>>, %arg8: memref<8x128xf32, #tpu.memory_space<vmem>>) attributes {dimension_semantics = [#tpu.dimension_semantics<parallel>, #tpu.dimension_semantics<parallel>, #tpu.dimension_semantics<parallel>, #tpu.dimension_semantics<arbitrary>], iteration_bounds = array<i64: 2, 1, 1, 1>, scalar_prefetch = 0 : i64, scratch_operands = 1 : i64, tpu.core_type = #tpu.core_type<tc>, window_params = [{transform_indices = @transform_0, window_bounds = array<i64: 1, 8, 128>}, {transform_indices = @transform_1, window_bounds = array<i64: 1, 128, 128>}, {transform_indices = @transform_2, window_bounds = array<i64: 1, 1, 128>}, {transform_indices = @transform_3, window_bounds = array<i64: 1, 8, 128>}]} {
    %c0_i32 = arith.constant 0 : i32
    %0 = arith.cmpi eq, %arg3, %c0_i32 : i32
    %1 = arith.extui %0 : i1 to i32
    %c0_i32_0 = arith.constant 0 : i32
    %2 = arith.cmpi ne, %1, %c0_i32_0 : i32
    scf.if %2 {
      %cst_12 = arith.constant 0.000000e+00 : f32
      %14 = vector.broadcast %cst_12 : f32 to vector<8x128xf32>
      %c0_13 = arith.constant 0 : index
      %c0_14 = arith.constant 0 : index
      %15 = vector.load %arg8[%c0_13, %c0_14] : memref<8x128xf32, #tpu.memory_space<vmem>>, vector<8x128xf32>
      tpu.vector_store %arg8[%c0_13, %c0_14], %14 {strides = array<i32>} : memref<8x128xf32, #tpu.memory_space<vmem>>, vector<8x128xf32>,
    } else {
    }
    %c0 = arith.constant 0 : index
    %c0_1 = arith.constant 0 : index
    %3 = vector.load %arg8[%c0, %c0_1] : memref<8x128xf32, #tpu.memory_space<vmem>>, vector<8x128xf32>
    %c0_2 = arith.constant 0 : index
    %c0_3 = arith.constant 0 : index
    %c0_4 = arith.constant 0 : index
    %4 = vector.load %arg4[%c0_2, %c0_3, %c0_4] : memref<1x8x128xf32, #tpu.memory_space<vmem>>, vector<1x8x128xf32>
    %5 = vector.shape_cast %4 : vector<1x8x128xf32> to vector<8x128xf32>
    %c0_5 = arith.constant 0 : index
    %c0_6 = arith.constant 0 : index
    %c0_7 = arith.constant 0 : index
    %6 = vector.load %arg5[%c0_5, %c0_6, %c0_7] : memref<1x128x128xf32, #tpu.memory_space<vmem>>, vector<1x128x128xf32>
    %7 = vector.shape_cast %6 : vector<1x128x128xf32> to vector<128x128xf32>
    %cst = arith.constant dense<0.000000e+00> : vector<8x128xf32>
    %8 = tpu.matmul %5, %7, %cst {dimension_numbers = #tpu.dot_dimension_numbers<[1], [0], [0], [1], [0, 0, 1, 1], [], []>} : vector<8x128xf32>, vector<128x128xf32>, vector<8x128xf32> -> vector<8x128xf32>
    %9 = arith.addf %3, %8 : vector<8x128xf32>
    %c0_8 = arith.constant 0 : index
    %c0_9 = arith.constant 0 : index
    %10 = vector.load %arg8[%c0_8, %c0_9] : memref<8x128xf32, #tpu.memory_space<vmem>>, vector<8x128xf32>
    tpu.vector_store %arg8[%c0_8, %c0_9], %9 {strides = array<i32>} : memref<8x128xf32, #tpu.memory_space<vmem>>, vector<8x128xf32>,
    %c0_i32_10 = arith.constant 0 : i32
    %11 = arith.cmpi eq, %arg3, %c0_i32_10 : i32
    %12 = arith.extui %11 : i1 to i32
    %c0_i32_11 = arith.constant 0 : i32
    %13 = arith.cmpi ne, %12, %c0_i32_11 : i32
    scf.if %13 {
      %c0_12 = arith.constant 0 : index
      %c0_13 = arith.constant 0 : index
      %14 = vector.load %arg8[%c0_12, %c0_13] : memref<8x128xf32, #tpu.memory_space<vmem>>, vector<8x128xf32>
      %c0_14 = arith.constant 0 : index
      %c0_15 = arith.constant 0 : index
      %c0_16 = arith.constant 0 : index
      %15 = vector.load %arg6[%c0_14, %c0_15, %c0_16] : memref<1x1x128xf32, #tpu.memory_space<vmem>>, vector<1x1x128xf32>
      %16 = vector.shape_cast %15 : vector<1x1x128xf32> to vector<1x128xf32>
      %17 = vector.broadcast %16 : vector<1x128xf32> to vector<8x128xf32>
      %18 = arith.addf %14, %17 : vector<8x128xf32>
      %c0_17 = arith.constant 0 : index
      %c0_18 = arith.constant 0 : index
      %c0_19 = arith.constant 0 : index
      %19 = vector.load %arg7[%c0_17, %c0_18, %c0_19] : memref<1x8x128xf32, #tpu.memory_space<vmem>>, vector<1x8x128xf32>
      %20 = vector.shape_cast %19 : vector<1x8x128xf32> to vector<8x128xf32>
      %21 = vector.shape_cast %18 : vector<8x128xf32> to vector<1x8x128xf32>
      tpu.vector_store %arg7[%c0_17, %c0_18, %c0_19], %21 {strides = array<i32>} : memref<1x8x128xf32, #tpu.memory_space<vmem>>, vector<1x8x128xf32>,
    } else {
    }
    return
  }
  func.func @transform_0(%arg0: i32, %arg1: i32, %arg2: i32, %arg3: i32) -> (i32, i32, i32) {
    %c0_i32 = arith.constant 0 : i32
    return %arg0, %arg1, %arg3 : i32, i32, i32
  }
  func.func @transform_1(%arg0: i32, %arg1: i32, %arg2: i32, %arg3: i32) -> (i32, i32, i32) {
    %c0_i32 = arith.constant 0 : i32
    return %arg0, %arg3, %arg2 : i32, i32, i32
  }
  func.func @transform_2(%arg0: i32, %arg1: i32, %arg2: i32, %arg3: i32) -> (i32, i32, i32) {
    %c0_i32 = arith.constant 0 : i32
    %c0_i32_0 = arith.constant 0 : i32
    return %arg0, %c0_i32, %arg2 : i32, i32, i32
  }
  func.func @transform_3(%arg0: i32, %arg1: i32, %arg2: i32, %arg3: i32) -> (i32, i32, i32) {
    %c0_i32 = arith.constant 0 : i32
    return %arg0, %arg1, %arg2 : i32, i32, i32
  }
}

</mosaic_0001>

<bundles_post_ra>
// kernel: tpu_custom_call.1
= control target key start
LH: loop header
LB: loop body
LE: loop exit
PB: predicated region body
PF: predicated region fallthrough
CT: control target
= control target key end

     0   :  { %8 = vsyncpa [#allocation4], 0  ;;  %s1142_s0 = inlined_call_operand.hbm [shape: f32[2,8,128], index: 0, kind: input, shape index: {}]   ;;  %s1143_s1 = inlined_call_operand.hbm [shape: f32[2,128,128], index: 1, kind: input, shape index: {}]   ;;  %s1144_s2 = inlined_call_operand.vmem [shape: f32[2,1,128], index: 2, kind: input, shape index: {}]   ;;  %s1145_s3 = inlined_call_operand.hbm [shape: f32[2,8,128], index: 3, kind: output, shape index: {}]  }
   0x1   :  { %10 = vsyncpa [#allocation4 + $0x1], 0 }
   0x2   :  { %11 = vsyncpa [#allocation7], 0 }
   0x3   :  { %13 = vsyncpa [#allocation7 + $0x1], 0 }
   0x4   :  { %14 = vsyncpa [#allocation5], 0 }
   0x5   :  { %16 = vsyncpa [#allocation5 + $0x1], 0  ;;  %s889_s12 = smov 0   ;;  %s891_s13 = smov 0  }
   0x6   :  { %s893_s14 = smov 0   ;;  %s895_s15 = smov 0  }
   0x7   :  { %s897_s16 = smov 0   ;;  %s899_s17 = smov 0  }
   0x8 LB: > { %s546_s18 = sadd.s32 4294967295, %s859_s17   ;;  %s547_s19 = sadd.s32 4294967294, %s859_s17   ;;  %s859_s17 = sphi %s899_s17, %s22_s17   ;;  %s855_s16 = sphi %s897_s16, %s1164_s16   ;;  %s851_s15 = sphi %s895_s15, %s1163_s15   ;;  %s847_s14 = sphi %s893_s14, %s1162_s14   ;;  %s843_s13 = sphi %s891_s13, %s1161_s13   ;;  %s839_s12 = sphi %s889_s12, %s1160_s12  }
   0x9   : > { %s48_s20 = sadd.s32 1, %s855_s16  ;;  %s59_s21 = sadd.s32 1, %s847_s14 }
   0xa   : > { %p50_p0 = scmp.ge.s32.totalorder %s48_s20, 2  ;;  %p66_p1 = scmp.ne.s32.totalorder %s847_s14, %s843_s13 }
   0xb   : > { %p67_p2 = scmp.eq.s32.totalorder %s859_s17, 0  ;;  %p72_p3 = scmp.ne.s32.totalorder %s843_s13, %s839_s12 }
   0xc   : > { %s1166_s20 = smov (%p50_p0, %s48_s20), 0  ;;  %p73_p5 = scmp.eq.s32.totalorder %s546_s18, 0 }
   0xd   : > { %p930_p4 = por %p67_p2, %p66_p1  ;;  %s52_s23 = ssub.s32 %s855_s16, %s1166_s20 }
   0xe   : > { %p158_p6 = scmp.eq.s32.totalorder %s546_s18, 1  ;;  %p57_p7 = scmp.eq.s32.totalorder %s52_s23, 0 }
   0xf   : > { %p936_p8 = por %p73_p5, %p72_p3  ;;  %p164_p10 = scmp.eq.s32.totalorder %s547_s19, 1 }
  0x10   : > { %p940_p9 = por %p158_p6, %p66_p1  ;;  %p658_p13 = scmp.lt.s32.totalorder %s859_s17, 2 }
  0x11   : > { %s1149_s24 = scalar_select %p936_p8, 1, 0 }
  0x12   : > { %s1150_s25 = scalar_select %p940_p9, 1, 0 }
  0x13   : > { %s945_s26 = scalar_select %p57_p7, %s847_s14, %s59_s21  }
  0x14   : > { %p947_p11 = por %p164_p10, %p72_p3  ;;  %s954_s28 = sand.u32 1, %s847_s14  }
  0x15   : > { %s550_s29 = sshll.u32 %s954_s28, 3  ;;  %s551_s30 = sshll.u32 %s855_s16, 7 }
  0x16   : > { %s1151_s27 = scalar_select %p947_p11, 1, 0 }
  0x17   : > { %s961_s6 = scalar_lea.hbm %s1142_s0, %s551_s30  ;;  %s188_s7 = scalar_lea.vmem [#allocation3], %s550_s29 }
  0x18   : > { %s197_s8 = sshll.u32 %s188_s7, 4  ;;  %p967_p0 = pnand %p658_p13, %p930_p4  ;;  %s963_s8 = int_to_ptr.vmem [resolvable:$true] %s197_s8 }
  0x19   : > { %s185_s10 = scalar_lea.sflag [#allocation4], %s954_s28  ;;  %s713_s11 = scalar_lea.hbm %s961_s6, 128 }
  0x1a   : > { %p714_p3 = scmp.ne.s32.totalorder %s961_s6, %s713_s11  ;;  %p715_p5 = pneg %p967_p0 }
  0x1b   : > { %s718_s21 = scalar_lea.hbm %s1142_s0, 256  ;;  %p719_p4 = scmp.lt.u32.totalorder %s961_s6, %s1142_s0 }
  0x1c   : > { %p716_p6 = pnand %p715_p5, %p714_p3  ;;  %p720_p10 = scmp.lt.u32.totalorder %s718_s21, %s713_s11 }
  0x1d   : > { %p722_p12 = scmp.lt.u32.totalorder %s713_s11, %s961_s6 }
  0x1e   : > { %p717_p7 = pneg %p716_p6  ;;  %p721_p13 = por %p720_p10, %p719_p4 }
  0x20   : > { %p723_p1 = por %p722_p12, %p721_p13 }
  0x22   : > { %p724_p2 = pnand %p723_p1, %p717_p7 }
  0x24   : > { %727 = shalt.err (!%p724_p2)
}
  0x25   : > { %s728_s29 = scalar_lea.vmem %s963_s8, 128  ;;  %s861_s30 = smov [#allocation3]  }
  0x26   : > { %p729_p3 = scmp.ne.s32.totalorder %s963_s8, %s728_s29  ;;  %s733_s4 = sshll.u32 %s861_s30, 4  ;;  %s734_s4 = int_to_ptr.vmem [resolvable:$false] %s733_s4 }
  0x27   : > { %s735_s5 = scalar_lea.vmem %s734_s4, 256  ;;  %p736_p9 = scmp.lt.s32.totalorder %s963_s8, %s734_s4 }
  0x28   : > { %p731_p6 = pnand %p729_p3, %p715_p5  ;;  %p737_p4 = scmp.lt.s32.totalorder %s735_s5, %s728_s29 }
  0x2a   : > { %p732_p11 = pneg %p731_p6  ;;  %p738_p10 = por %p737_p4, %p736_p9 }
  0x2c   : > { %p739_p12 = pnand %p738_p10, %p732_p11 }
  0x2e   : > { %742 = shalt.err (!%p739_p12)
}
  0x2f   : > { %650 = dma.hbm_to_vmem [thread:$0]  (!%p967_p0), %s961_s6, 128, %s963_s8, %s185_s10  }
  0x30   : > { %p1153_p1 = scmp.lt.s32.totalorder %s859_s17, 3  ;;  %p1154_p2 = scmp.ge.s32.totalorder %s859_s17, 1 }
  0x31   : > { %s552_s11 = sshll.u32 %s954_s28, 7  ;;  %s564_s18 = sshll.u32 %s855_s16, 11 }
  0x32   : > { %p1003_p7 = pnand %p1154_p2, %p1153_p1  ;;  %s1012_s22 = scalar_lea.hbm %s1143_s1, %s564_s18 }
  0x33   : > { %s208_s23 = scalar_lea.vmem [#allocation6], %s552_s11  ;;  %s205_s6 = scalar_lea.sflag [#allocation7], %s954_s28 }
  0x34   : > { %s218_s29 = sshll.u32 %s208_s23, 4  ;;  %s743_s8 = scalar_lea.hbm %s1012_s22, 2048  ;;  %s1014_s29 = int_to_ptr.vmem [resolvable:$true] %s218_s29 }
  0x35   : > { %p744_p9 = scmp.ne.s32.totalorder %s1012_s22, %s743_s8  ;;  %s748_s4 = scalar_lea.hbm %s1143_s1, 4096 }
  0x36   : > { %p749_p3 = scmp.lt.u32.totalorder %s1012_s22, %s1143_s1  ;;  %p750_p6 = scmp.lt.u32.totalorder %s748_s4, %s743_s8 }
  0x37   : > { %p746_p11 = pnand %p744_p9, %p715_p5  ;;  %p752_p10 = scmp.lt.u32.totalorder %s743_s8, %s1012_s22 }
  0x38   : > { %p751_p4 = por %p750_p6, %p749_p3 }
  0x39   : > { %p747_p13 = pneg %p746_p11 }
  0x3a   : > { %p753_p12 = por %p752_p10, %p751_p4 }
  0x3c   : > { %p754_p1 = pnand %p753_p12, %p747_p13 }
  0x3e   : > { %757 = shalt.err (!%p754_p1)
}
  0x3f   : > { %s758_s11 = scalar_lea.vmem %s1014_s29, 2048  ;;  %s862_s19 = smov [#allocation6]  }
  0x40   : > { %p759_p2 = scmp.ne.s32.totalorder %s1014_s29, %s758_s11  ;;  %s763_s21 = sshll.u32 %s862_s19, 4  ;;  %s764_s21 = int_to_ptr.vmem [resolvable:$false] %s763_s21 }
  0x41   : > { %s765_s23 = scalar_lea.vmem %s764_s21, 4096  ;;  %p766_p8 = scmp.lt.s32.totalorder %s1014_s29, %s764_s21 }
  0x42   : > { %p761_p9 = pnand %p759_p2, %p715_p5  ;;  %p767_p3 = scmp.lt.s32.totalorder %s765_s23, %s758_s11 }
  0x44   : > { %p762_p11 = pneg %p761_p9  ;;  %p768_p6 = por %p767_p3, %p766_p8 }
  0x46   : > { %p769_p4 = pnand %p768_p6, %p762_p11 }
  0x48   : > { %772 = shalt.err (!%p769_p4)
}
  0x49   : > { %s863_s8 = smov 128   ;;  %s864_s10 = smov 8  }
  0x4a   : > { %653 = dma.hbm_to_vmem [thread:$0]  (!%p967_p0), %s1012_s22, 2048, %s1014_s29, %s205_s6, %s863_s8, %s863_s8, %s864_s10  }
  0x4b   : > { %239 = sbr.rel (%p1003_p7) target bundleno = 348 (0x15c), region = 32  ;;  %s1045_s30 = sand.u32 (!%p1003_p7), 1, %s843_s13  }
  0x4c   : > { %s556_s4 = sshll.u32 (!%p1003_p7), %s1045_s30, 3  ;;  %s242_s5 = scalar_lea.sflag (!%p1003_p7), [#allocation4], %s1045_s30 }
  0x4d   : > { %s1051_s18 = scalar_lea.vmem (!%p1003_p7), [#allocation3], %s556_s4  ;;  %p1156_p8 = scmp.ne.s32.totalorder (!%p1003_p7), %s1149_s24, 0 }
  0x52   : > { %826 = dma.done.wait (%p1156_p8), %s242_s5, 128  }
  0x53   : > { %828 = vsyncadd (%p1156_p8), %s242_s5, 4294967168  ;;  %s557_s28 = sshll.u32 %s1045_s30, 7  ;;  %s251_s9 = scalar_lea.sflag [#allocation7], %s1045_s30 }
  0x54   : > { %s1059_s7 = scalar_lea.vmem [#allocation6], %s557_s28 }
  0x55   : > { %830 = dma.done.wait (%p1156_p8), %s251_s9, 2048  }
  0x56   : > { %832 = vsyncadd (%p1156_p8), %s251_s9, 4294965248  ;;  %v865_v0 = vmov 0.0|0.0   ;;  %vm866_vm0 = vmmov 0   ;;  %v867_v1 = vmov 0.0   ;;  %v302_v2 = vld [vmem:[%s1059_s7] sm:$0xff]  ;;  %v303_v3 = vld [vmem:[%s1059_s7 + $0x8] sm:$0xff] }
  0x57   : > { %617 = vmatprep.subr.bf16.mxu0 %v865_v0  ;;  %614 = vmatprep.mubr.msk.f32.mxu0 %vm866_vm0, %v867_v1  ;;  %v304_v4 = vld [vmem:[%s1059_s7 + $0x10] sm:$0xff]  ;;  %v618_v5 = vpack.c.bf16 %v303_v3, %v302_v2  ;;  %v305_v6 = vld [vmem:[%s1059_s7 + $0x18] sm:$0xff]  ;;  %v306_v8 = vld [vmem:[%s1059_s7 + $0x20] sm:$0xff]  ;;  %p289_p0 = scmp.lt.s32.totalorder %s851_s15, 1  ;;  %s561_s11 = sshll.u32 %s851_s15, 7 }
  0x58   : > { %v621_v7 = vpack.c.bf16 %v305_v6, %v304_v4  ;;  %v307_v9 = vld [vmem:[%s1059_s7 + $0x28] sm:$0xff]  ;;  %v308_v11 = vld [vmem:[%s1059_s7 + $0x30] sm:$0xff]  ;;  %v309_v12 = vld [vmem:[%s1059_s7 + $0x38] sm:$0xff]  ;;  %s287_s19 = scalar_lea.vmem [#allocation8], %s556_s4  ;;  %s1093_s10 = scalar_lea.hbm %s1145_s3, %s561_s11 }
  0x59   : > { %619 = vmatpush3.bf16.msra.mxu0 %v618_v5  ;;  %v624_v10 = vpack.c.bf16 %v307_v9, %v306_v8  ;;  %v627_v13 = vpack.c.bf16 %v309_v12, %v308_v11  ;;  %v310_v14 = vld [vmem:[%s1059_s7 + $0x40] sm:$0xff]  ;;  %v311_v15 = vld [vmem:[%s1059_s7 + $0x48] sm:$0xff]  ;;  %v312_v17 = vld [vmem:[%s1059_s7 + $0x50] sm:$0xff]  ;;  %s290_s24 = scalar_select %p289_p0, %s851_s15, 1 }
  0x5a   : > { %620 = vmatprep.subr.bf16.mxu0 %v865_v0  ;;  %v630_v16 = vpack.c.bf16 %v311_v15, %v310_v14  ;;  %v313_v18 = vld [vmem:[%s1059_s7 + $0x58] sm:$0xff]  ;;  %v314_v20 = vld [vmem:[%s1059_s7 + $0x60] sm:$0xff]  ;;  %v315_v21 = vld [vmem:[%s1059_s7 + $0x68] sm:$0xff]  ;;  %s419_s21 = sshll.u32 %s287_s19, 4  ;;  %s404_s5 = scalar_lea.sflag [#allocation5], %s1045_s30  ;;  %s1095_s21 = int_to_ptr.vmem [resolvable:$true] %s419_s21 }
  0x5b   : > { %v633_v19 = vpack.c.bf16 %v313_v18, %v312_v17  ;;  %v636_v22 = vpack.c.bf16 %v315_v21, %v314_v20  ;;  %v316_v23 = vld [vmem:[%s1059_s7 + $0x70] sm:$0xff]  ;;  %v317_v24 = vld [vmem:[%s1059_s7 + $0x78] sm:$0xff]  ;;  %s294_s6 = scalar_lea.vmem %s1144_s2, %s290_s24  ;;  %p1157_p7 = scmp.ne.s32.totalorder %s1150_s25, 0 }
  0x5c   : > { %v639_v25 = vpack.c.bf16 %v317_v24, %v316_v23  ;;  %v301_v26 = vld [vmem:[%s1051_s18] sm:$0xff]  ;;  %s773_s18 = scalar_lea.vmem %s1095_s21, 128  ;;  %s868_s15 = smov [#allocation8]  }
  0x5d   : > { %622 = vmatpush3.bf16.msra.mxu0 %v621_v7  ;;  %v559_v27 = vld [vmem:[%s294_s6] ss:$0 sm:$0xff]  ;;  %p774_p5 = scmp.ne.s32.totalorder %s1095_s21, %s773_s18  ;;  %s777_s4 = sshll.u32 %s868_s15, 4  ;;  %s778_s4 = int_to_ptr.vmem [resolvable:$false] %s777_s4 }
  0x5e   : > { %623 = vmatprep.subr.bf16.mxu0 %v865_v0  ;;  %s779_s28 = scalar_lea.vmem %s778_s4, 256  ;;  %p780_p12 = scmp.lt.s32.totalorder %s1095_s21, %s778_s4 }
  0x5f   : > { %p775_p13 = pnand %p774_p5, %p1157_p7  ;;  %p781_p1 = scmp.lt.s32.totalorder %s779_s28, %s773_s18 }
  0x61   : > { %625 = vmatpush3.bf16.msra.mxu0 %v624_v10  ;;  %p776_p10 = pneg %p775_p13  ;;  %p782_p2 = por %p781_p1, %p780_p12 }
  0x62   : > { %626 = vmatprep.subr.bf16.mxu0 %v865_v0 }
  0x63   : > { %p783_p9 = pnand %p782_p2, %p776_p10 }
  0x65   : > { %628 = vmatpush3.bf16.msra.mxu0 %v627_v13 }
  0x66   : > { %629 = vmatprep.subr.bf16.mxu0 %v865_v0 }
  0x69   : > { %631 = vmatpush3.bf16.msra.mxu0 %v630_v16 }
  0x6a   : > { %632 = vmatprep.subr.bf16.mxu0 %v865_v0 }
  0x6d   : > { %634 = vmatpush3.bf16.msra.mxu0 %v633_v19 }
  0x6e   : > { %635 = vmatprep.subr.bf16.mxu0 %v865_v0 }
  0x71   : > { %637 = vmatpush3.bf16.msra.mxu0 %v636_v22 }
  0x72   : > { %638 = vmatprep.subr.bf16.mxu0 %v865_v0 }
  0x75   : > { %640 = vmatpush3.bf16.msra.mxu0 %v639_v25 }
  0x78   : > { %615 = vmatmul.mubr.f32.vlgmr.msra.gmra.mrb[0].mxu0 %v301_v26 }
 0x14b   : > { %v384_v28 = vpop.f32.mrb[0].mxu0 }
 0x14c   : > { %v401_v29 = vadd.f32 %v559_v27, %v384_v28  ;;  %v616_v30 = vpop.f32.mrb[1].mxu0 }
 0x14e   : > { %402 = vst [vmem:[%s287_s19] sm:$0xff] %v401_v29 }
 0x14f   : > { %786 = shalt.err (!%p783_p9)
}
 0x150   : > { %s787_s30 = scalar_lea.hbm %s1093_s10, 128  ;;  %s791_s24 = scalar_lea.hbm %s1145_s3, 256 }
 0x151   : > { %p788_p11 = scmp.ne.s32.totalorder %s1093_s10, %s787_s30  ;;  %p792_p4 = scmp.lt.u32.totalorder %s1093_s10, %s1145_s3 }
 0x152   : > { %p793_p8 = scmp.lt.u32.totalorder %s791_s24, %s787_s30  ;;  %p795_p5 = scmp.lt.u32.totalorder %s787_s30, %s1093_s10 }
 0x153   : > { %p789_p3 = pnand %p788_p11, %p1157_p7 }
 0x154   : > { %p794_p0 = por %p793_p8, %p792_p4 }
 0x155   : > { %p790_p6 = pneg %p789_p3 }
 0x156   : > { %p796_p13 = por %p795_p5, %p794_p0 }
 0x158   : > { %p797_p10 = pnand %p796_p13, %p790_p6 }
 0x15a   : > { %800 = shalt.err (!%p797_p10)
}
 0x15b   : > { %645 = dma.vmem_to_hbm [thread:$0]  (%p1157_p7), %s1095_s21, 128, %s1093_s10, %s404_s5  }
 0x15c PF: > { %s431_s6 = sand.u32 1, %s839_s12   ;;  %p1158_p12 = scmp.ne.s32.totalorder %s1151_s27, 0 }
 0x15d   : > { %p1159_p1 = scmp.ge.s32.totalorder %s859_s17, 2  ;;  %s432_s11 = scalar_lea.sflag [#allocation5], %s431_s6 }
 0x15f   : > { %p655_p2 = pnand %p1159_p1, %p1158_p12 }
 0x161   : > { %834 = dma.done.wait (!%p655_p2), %s432_s11, 128  }
 0x162   : > { %836 = vsyncadd (!%p655_p2), %s432_s11, 4294967168  ;;  %s22_s17 = sadd.s32 1, %s859_s17   ;;  %s1160_s12 = smov %s843_s13 }
 0x163   : > { %p19_p9 = scmp.ge.s32.totalorder %s22_s17, 4   ;;  %s1161_s13 = smov %s847_s14 }
 0x164   : > { %s1162_s14 = smov %s945_s26  ;;  %s1163_s15 = smov %s855_s16 }
 0x165   : > { %s1164_s16 = smov %s1166_s20  ;;  %21 = sbr.rel (!%p19_p9) target bundleno = 8 (0x8), region = 101 }
 0x16c   :  { %437 = vsyncpa [#allocation4], 1 }
 0x16d   :  { %439 = vsyncpa [#allocation4 + $0x1], 1 }
 0x16e   :  { %440 = vsyncpa [#allocation7], 1 }
 0x16f   :  { %442 = vsyncpa [#allocation7 + $0x1], 1 }
 0x170   :  { %443 = vsyncpa [#allocation5], 1 }
 0x171   :  { %445 = vsyncpa [#allocation5 + $0x1], 1 }

</bundles_post_ra>
